<compile_context>
chip_gen: v6e
topology: v6e:2x2x1
jax: 0.10.0
libtpu: 0.0.40
codegen_flags: <defaults>
</compile_context>

<pallas_src>
import functools

import jax
import jax.numpy as jnp
from jax.experimental import pallas as pl
from jax.experimental.pallas import tpu as pltpu


def _round_up(x, m):
    return (x + m - 1) // m * m


def cart_mlp_kernel(x_ref, w1_ref, b1_ref, w2_ref, b2_ref, o_ref):
    # Layer 1: (TB, in) @ (in, H) on the MXU. Operands bf16 (MXU-native on
    # v5e/v6e/v7x), accumulate in f32; bias + ReLU in f32 on the VPU.
    # NOTE: K=4 under-fills the MXU rows; a 4-term VPU broadcast-FMA is an
    # alternative if profiling ever shows this push on the critical path.
    x = x_ref[...].astype(jnp.bfloat16)
    h = jnp.dot(x, w1_ref[...], preferred_element_type=jnp.float32)
    h = jnp.maximum(h + b1_ref[...], 0.0)
    # Layer 2: (TB, H) @ (H, N_pad). N_pad is a multiple of 128, so the store
    # below is lane-dense (unmasked vst, no vst.msk partial stores).
    out = jnp.dot(h.astype(jnp.bfloat16), w2_ref[...],
                  preferred_element_type=jnp.float32)
    o_ref[...] = (out + b2_ref[...]).astype(o_ref.dtype)


def prepare_params(w1, b1, w2, b2):
    """One-time prep (keep OUT of the per-step hot path):
      * zero-pad the output-feature dim of w2/b2 to a multiple of 128 so the
        kernel's output store is lane-dense,
      * cast weight matrices to bf16 (halves weight DMA bytes, MXU-native),
      * keep biases in f32 for the f32 epilogue.
    Extra output columns have zero weight and zero bias -> exactly zero."""
    out_size = w2.shape[1]
    n_pad = _round_up(out_size, 128)
    if n_pad != out_size:
        w2 = jnp.pad(w2, ((0, 0), (0, n_pad - out_size)))
        b2 = jnp.pad(b2, ((0, 0), (0, n_pad - out_size)))
    return (w1.astype(jnp.bfloat16), b1.astype(jnp.float32),
            w2.astype(jnp.bfloat16), b2.astype(jnp.float32))


@functools.partial(jax.jit, static_argnames=("out_size", "block_b"))
def cart_network_forward(x, w1, b1, w2, b2, *, out_size=None, block_b=512):
    """x: (B, in) f32; w1: (in, H) bf16; b1: (1, H) f32;
    w2: (H, N_pad) bf16; b2: (1, N_pad) f32 (pre-padded via prepare_params).
    Returns (B, out_size) f32 (or (B, N_pad) if out_size is None)."""
    B, in_size = x.shape
    H = w1.shape[1]
    n_pad = w2.shape[1]

    # Batch only needs the 8-sublane alignment; B=256 etc. pads nothing.
    b_pad = _round_up(B, 8)
    if b_pad != B:
        x = jnp.pad(x, ((0, b_pad - B), (0, 0)))

    if b_pad <= block_b:
        # Small batch (the common case): one block, no grid. Total footprint
        # is <1 MiB, trivially VMEM-resident on v5e/v6e/v7x.
        out = pl.pallas_call(
            cart_mlp_kernel,
            out_shape=jax.ShapeDtypeStruct((b_pad, n_pad), jnp.float32),
            in_specs=[pl.BlockSpec(memory_space=pltpu.MemorySpace.VMEM)] * 5,
            out_specs=pl.BlockSpec(memory_space=pltpu.MemorySpace.VMEM),
        )(x, w1, b1, w2, b2)
    else:
        # Large-batch fallback: 256-row tiles (multiple of 8; fills the
        # 256-wide MXU on v6e/v7x, v5e just sees fewer grid steps). Weights /
        # biases keep constant index maps -> fetched once, VMEM-resident.
        tb = _round_up(min(block_b, b_pad), 256)
        b_pad2 = _round_up(b_pad, tb)
        if b_pad2 != b_pad:
            x = jnp.pad(x, ((0, b_pad2 - b_pad), (0, 0)))
            b_pad = b_pad2
        n_steps = b_pad // tb
        out = pl.pallas_call(
            cart_mlp_kernel,
            out_shape=jax.ShapeDtypeStruct((b_pad, n_pad), jnp.float32),
            grid=(n_steps,),
            in_specs=[
                pl.BlockSpec((tb, in_size), lambda i: (i, 0)),
                pl.BlockSpec((in_size, H), lambda i: (0, 0)),
                pl.BlockSpec((1, H), lambda i: (0, 0)),
                pl.BlockSpec((H, n_pad), lambda i: (0, 0)),
                pl.BlockSpec((1, n_pad), lambda i: (0, 0)),
            ],
            out_specs=pl.BlockSpec((tb, n_pad), lambda i: (i, 0)),
            compiler_params=pltpu.CompilerParams(
                # Only shard across cores when there are >= 2 sizeable steps.
                dimension_semantics=(
                    ("parallel",) if n_steps >= 2 else ("arbitrary",))),
        )(x, w1, b1, w2, b2)

    # Trim padding. If the consumer tolerates the padded (B, n_pad) output,
    # pass out_size=None to skip this slice entirely.
    if out_size is None:
        return out[:B]
    return out[:B, :out_size]


def init_params(key, input_size, output_size, num_hidden=128, dtype=jnp.float32):
    """Deterministic init mimicking nn.Linear's uniform(-1/sqrt(fan_in), 1/sqrt(fan_in))."""
    k1, k2, k3, k4 = jax.random.split(key, 4)
    bound1 = 1.0 / jnp.sqrt(jnp.array(input_size, dtype=jnp.float32))
    bound2 = 1.0 / jnp.sqrt(jnp.array(num_hidden, dtype=jnp.float32))
    # Stored as (in_features, out_features) so the kernel does x @ W.
    w1 = jax.random.uniform(k1, (input_size, num_hidden), dtype, -bound1, bound1)
    b1 = jax.random.uniform(k2, (1, num_hidden), dtype, -bound1, bound1)
    w2 = jax.random.uniform(k3, (num_hidden, output_size), dtype, -bound2, bound2)
    b2 = jax.random.uniform(k4, (1, output_size), dtype, -bound2, bound2)
    return w1, b1, w2, b2


if __name__ == "__main__":
    # CartPole-like sizes: 4 observations -> 128 hidden -> 2 actions.
    batch, input_size, num_hidden, output_size = 256, 4, 128, 2

    key = jax.random.PRNGKey(0)
    kx, kp = jax.random.split(key)
    x = jax.random.normal(kx, (batch, input_size), jnp.float32)
    w1, b1, w2, b2 = init_params(kp, input_size, output_size, num_hidden)

    # One-time parameter prep (padding + bf16 cast) outside the hot path.
    w1p, b1p, w2p, b2p = prepare_params(w1, b1, w2, b2)

    out = jax.block_until_ready(
        cart_network_forward(x, w1p, b1p, w2p, b2p, out_size=output_size))
    assert out.shape == (batch, output_size)

    # Reference 1: same bf16-operand / f32-accumulate arithmetic -> tight tol.
    ref_h = jnp.maximum(
        jnp.dot(x.astype(jnp.bfloat16), w1p,
                preferred_element_type=jnp.float32) + b1p, 0.0)
    ref_bf16 = (jnp.dot(ref_h.astype(jnp.bfloat16), w2p,
                        preferred_element_type=jnp.float32) + b2p)[:, :output_size]
    assert jnp.allclose(out, ref_bf16, atol=1e-4, rtol=1e-4)

    # Reference 2: full-f32 PyTorch-equivalent math -> loose tol (bf16 inputs).
    ref_f32 = jnp.maximum(x @ w1 + b1, 0.0) @ w2 + b2
    assert jnp.allclose(out, ref_f32, atol=5e-2, rtol=5e-2)

    print("KERNEL_OK")
</pallas_src>

<mosaic_0001>
module attributes {stable_mosaic.version = 11 : i64} {
  func.func @cart_mlp_kernel(%arg0: memref<256x4xf32, #tpu.memory_space<vmem>>, %arg1: memref<4x128xbf16, #tpu.memory_space<vmem>>, %arg2: memref<1x128xf32, #tpu.memory_space<vmem>>, %arg3: memref<128x128xbf16, #tpu.memory_space<vmem>>, %arg4: memref<1x128xf32, #tpu.memory_space<vmem>>, %arg5: memref<256x128xf32, #tpu.memory_space<vmem>>) attributes {dimension_semantics = [], scalar_prefetch = 0 : i64, scratch_operands = 0 : i64, tpu.core_type = #tpu.core_type<tc>} {
    %c0 = arith.constant 0 : index
    %c0_0 = arith.constant 0 : index
    %0 = vector.load %arg0[%c0, %c0_0] : memref<256x4xf32, #tpu.memory_space<vmem>>, vector<256x4xf32>
    %1 = arith.truncf %0 : vector<256x4xf32> to vector<256x4xbf16>
    %c0_1 = arith.constant 0 : index
    %c0_2 = arith.constant 0 : index
    %2 = vector.load %arg1[%c0_1, %c0_2] : memref<4x128xbf16, #tpu.memory_space<vmem>>, vector<4x128xbf16>
    %cst = arith.constant dense<0.000000e+00> : vector<256x128xf32>
    %3 = tpu.matmul %1, %2, %cst {dimension_numbers = #tpu.dot_dimension_numbers<[1], [0], [0], [1], [0, 0, 1, 1], [], []>} : vector<256x4xbf16>, vector<4x128xbf16>, vector<256x128xf32> -> vector<256x128xf32>
    %c0_3 = arith.constant 0 : index
    %c0_4 = arith.constant 0 : index
    %4 = vector.load %arg2[%c0_3, %c0_4] : memref<1x128xf32, #tpu.memory_space<vmem>>, vector<1x128xf32>
    %5 = vector.broadcast %4 : vector<1x128xf32> to vector<256x128xf32>
    %6 = arith.addf %3, %5 : vector<256x128xf32>
    %cst_5 = arith.constant 0.000000e+00 : f32
    %7 = vector.broadcast %cst_5 : f32 to vector<256x128xf32>
    %8 = arith.maximumf %6, %7 : vector<256x128xf32>
    %9 = arith.truncf %8 : vector<256x128xf32> to vector<256x128xbf16>
    %c0_6 = arith.constant 0 : index
    %c0_7 = arith.constant 0 : index
    %10 = vector.load %arg3[%c0_6, %c0_7] : memref<128x128xbf16, #tpu.memory_space<vmem>>, vector<128x128xbf16>
    %cst_8 = arith.constant dense<0.000000e+00> : vector<256x128xf32>
    %11 = tpu.matmul %9, %10, %cst_8 {dimension_numbers = #tpu.dot_dimension_numbers<[1], [0], [0], [1], [0, 0, 1, 1], [], []>} : vector<256x128xbf16>, vector<128x128xbf16>, vector<256x128xf32> -> vector<256x128xf32>
    %c0_9 = arith.constant 0 : index
    %c0_10 = arith.constant 0 : index
    %12 = vector.load %arg4[%c0_9, %c0_10] : memref<1x128xf32, #tpu.memory_space<vmem>>, vector<1x128xf32>
    %13 = vector.broadcast %12 : vector<1x128xf32> to vector<256x128xf32>
    %14 = arith.addf %11, %13 : vector<256x128xf32>
    %c0_11 = arith.constant 0 : index
    %c0_12 = arith.constant 0 : index
    %15 = vector.load %arg5[%c0_11, %c0_12] : memref<256x128xf32, #tpu.memory_space<vmem>>, vector<256x128xf32>
    tpu.vector_store %arg5[%c0_11, %c0_12], %14 {strides = array<i32>} : memref<256x128xf32, #tpu.memory_space<vmem>>, vector<256x128xf32>,
    return
  }
}

</mosaic_0001>

<bundles_post_ra>
// kernel: cart_network_forward.1
= control target key start
LH: loop header
LB: loop body
LE: loop exit
PB: predicated region body
PF: predicated region fallthrough
CT: control target
= control target key end

     0   :  { %vm126_vm0 = vcmask 1041408   ;;  %vm77_vm1 = vcmask 31744   ;;  %s1120_s1 = inlined_call_operand.vmem [shape: bf16[4,128], index: 1, kind: input, shape index: {}]   ;;  %s1121_s0 = inlined_call_operand.vmem [shape: f32[256,4], index: 0, kind: input, shape index: {}]   ;;  %s1122_s3 = inlined_call_operand.vmem [shape: bf16[128,128], index: 3, kind: input, shape index: {}]   ;;  %s1123_s2 = inlined_call_operand.vmem [shape: f32[1,128], index: 2, kind: input, shape index: {}]   ;;  %s1124_s4 = inlined_call_operand.vmem [shape: f32[1,128], index: 4, kind: input, shape index: {}]   ;;  %s1125_s5 = inlined_call_operand.vmem [shape: f32[256,128], index: 5, kind: output, shape index: {}]  }
   0x1   :  { %v69_v0 = vld [vmem:[%s1120_s1] sm:$0x3]  ;;  %v22_v2 = vld [vmem:[%s1121_s0 + $0x8] sm:$0xff]  ;;  %v23_v5 = vld [vmem:[%s1121_s0 + $0x10] sm:$0xff] }
   0x2   :  { %v21_v1 = vld [vmem:[%s1121_s0] sm:$0xff]  ;;  %772 = vmatprep.subr.msk.bf16.mxu0 %vm126_vm0, %v69_v0  ;;  %v128_v3 = vsel %vm126_vm0, %v69_v0, 0  ;;  %v24_v6 = vld [vmem:[%s1121_s0 + $0x18] sm:$0xff]  ;;  %v26_v9 = vld [vmem:[%s1121_s0 + $0x28] sm:$0xff] }
   0x3   :  { %v53_v4 = vpack.c.bf16 %v22_v2, %v21_v1  ;;  %v25_v7 = vld [vmem:[%s1121_s0 + $0x20] sm:$0xff]  ;;  %675 = vmatpush3.bf16.msra.mxu0 %v128_v3  ;;  %v54_v8 = vpack.c.bf16 %v24_v6, %v23_v5  ;;  %v27_v11 = vld [vmem:[%s1121_s0 + $0x30] sm:$0xff]  ;;  %v28_v12 = vld [vmem:[%s1121_s0 + $0x38] sm:$0xff] }
   0x4   :  { %v55_v10 = vpack.c.bf16 %v26_v9, %v25_v7  ;;  %v29_v13 = vld [vmem:[%s1121_s0 + $0x40] sm:$0xff]  ;;  %v30_v14 = vld [vmem:[%s1121_s0 + $0x48] sm:$0xff]  ;;  %v56_v15 = vpack.c.bf16 %v28_v12, %v27_v11  ;;  %v773_v17 = vld [vmem:[%s1122_s3 + $0x38] sm:$0xff]  }
   0x5   :  { %676 = vmatprep.mubr.msk.bf16.mxu0 %vm77_vm1, %v53_v4  ;;  %v57_v16 = vpack.c.bf16 %v30_v14, %v29_v13  ;;  %v31_v18 = vld [vmem:[%s1121_s0 + $0x50] sm:$0xff]  ;;  %v32_v19 = vld [vmem:[%s1121_s0 + $0x58] sm:$0xff]  ;;  %v33_v21 = vld [vmem:[%s1121_s0 + $0x60] sm:$0xff]  ;;  %708 = vmatprep.subr.bf16.mxu0 %v773_v17 }
   0x6   :  { %677 = vmatmul.mubr.msk.bf16.vlgmr.msra.gmra.mxu0 %vm77_vm1, %v54_v8  ;;  %v774_v20 = vld [vmem:[%s1122_s3 + $0x30] sm:$0xff]   ;;  %v34_v22 = vld [vmem:[%s1121_s0 + $0x68] sm:$0xff]  ;;  %756 = vmatprep.subr.bf16.mxu1 %v773_v17  ;;  %v58_v24 = vpack.c.bf16 %v32_v19, %v31_v18  ;;  %v776_v26 = vld [vmem:[%s1122_s3 + $0x20] sm:$0xff]  }
   0x7   :  { %680 = vmatprep.mubr.msk.bf16.mxu0 %vm77_vm1, %v55_v10  ;;  %709 = vmatpush3.bf16.msra.mxu0 %v773_v17  ;;  %v775_v23 = vld [vmem:[%s1122_s3 + $0x28] sm:$0xff]   ;;  %v59_v25 = vpack.c.bf16 %v34_v22, %v33_v21  ;;  %v35_v27 = vld [vmem:[%s1121_s0 + $0x70] sm:$0xff]  ;;  %v36_v28 = vld [vmem:[%s1121_s0 + $0x78] sm:$0xff] }
   0x8   :  { %710 = vmatprep.subr.bf16.mxu0 %v774_v20  ;;  %764 = vmatpush3.bf16.msra.mxu1 %v773_v17  ;;  %v37_v29 = vld [vmem:[%s1121_s0 + $0x80] sm:$0xff]  ;;  %v38_v30 = vld [vmem:[%s1121_s0 + $0x88] sm:$0xff]  ;;  %v777_v31 = vld [vmem:[%s1122_s3 + $0x18] sm:$0xff]   ;;  %v60_v32 = vpack.c.bf16 %v36_v28, %v35_v27 }
   0x9   :  { %757 = vmatprep.subr.bf16.mxu1 %v774_v20  ;;  %v61_v33 = vpack.c.bf16 %v38_v30, %v37_v29  ;;  %v39_v34 = vld [vmem:[%s1121_s0 + $0x90] sm:$0xff]  ;;  %v40_v35 = vld [vmem:[%s1121_s0 + $0x98] sm:$0xff]  ;;  %v41_v36 = vld [vmem:[%s1121_s0 + $0xa0] sm:$0xff] }
   0xa   :  { %v42_v37 = vld [vmem:[%s1121_s0 + $0xa8] sm:$0xff]  ;;  %v62_v38 = vpack.c.bf16 %v40_v35, %v39_v34  ;;  %v43_v40 = vld [vmem:[%s1121_s0 + $0xb0] sm:$0xff]  ;;  %v44_v41 = vld [vmem:[%s1121_s0 + $0xb8] sm:$0xff] }
   0xb   :  { %711 = vmatpush3.bf16.msra.mxu0 %v774_v20  ;;  %v63_v39 = vpack.c.bf16 %v42_v37, %v41_v36  ;;  %v45_v42 = vld [vmem:[%s1121_s0 + $0xc0] sm:$0xff]  ;;  %v46_v43 = vld [vmem:[%s1121_s0 + $0xc8] sm:$0xff]  ;;  %v64_v44 = vpack.c.bf16 %v44_v41, %v43_v40  ;;  %v47_v46 = vld [vmem:[%s1121_s0 + $0xd0] sm:$0xff] }
   0xc   :  { %712 = vmatprep.subr.bf16.mxu0 %v775_v23  ;;  %765 = vmatpush3.bf16.msra.mxu1 %v774_v20  ;;  %v65_v45 = vpack.c.bf16 %v46_v43, %v45_v42  ;;  %v48_v47 = vld [vmem:[%s1121_s0 + $0xd8] sm:$0xff]  ;;  %v49_v48 = vld [vmem:[%s1121_s0 + $0xe0] sm:$0xff]  ;;  %v50_v49 = vld [vmem:[%s1121_s0 + $0xe8] sm:$0xff] }
   0xd   :  { %758 = vmatprep.subr.bf16.mxu1 %v775_v23  ;;  %v66_v50 = vpack.c.bf16 %v48_v47, %v47_v46  ;;  %v67_v51 = vpack.c.bf16 %v50_v49, %v49_v48  ;;  %v51_v52 = vld [vmem:[%s1121_s0 + $0xf0] sm:$0xff]  ;;  %v52_v53 = vld [vmem:[%s1121_s0 + $0xf8] sm:$0xff]  ;;  %v779_v56 = vld [vmem:[%s1122_s3 + $0x8] sm:$0xff]  }
   0xe   :  { %681 = vmatmul.mubr.msk.bf16.gmra.mxu0 %vm77_vm1, %v56_v15  ;;  %v68_v54 = vpack.c.bf16 %v52_v53, %v51_v52  ;;  %v778_v55 = vld [vmem:[%s1122_s3 + $0x10] sm:$0xff]   ;;  %v780_v57 = vld [vmem:[%s1122_s3] sm:$0xff]  }
   0xf   :  { %684 = vmatprep.mubr.msk.bf16.mxu0 %vm77_vm1, %v57_v16  ;;  %713 = vmatpush3.bf16.msra.mxu0 %v775_v23  ;;  %v953_v60 = vld [vmem:[%s1123_s2] ss:$0 sm:$0xff] }
  0x10   :  { %714 = vmatprep.subr.bf16.mxu0 %v776_v26  ;;  %766 = vmatpush3.bf16.msra.mxu1 %v775_v23 }
  0x11   :  { %759 = vmatprep.subr.bf16.mxu1 %v776_v26 }
  0x13   :  { %715 = vmatpush3.bf16.msra.mxu0 %v776_v26 }
  0x14   :  { %716 = vmatprep.subr.bf16.mxu0 %v777_v31  ;;  %767 = vmatpush3.bf16.msra.mxu1 %v776_v26 }
  0x15   :  { %760 = vmatprep.subr.bf16.mxu1 %v777_v31 }
  0x16   :  { %685 = vmatmul.mubr.msk.bf16.gmra.mxu0 %vm77_vm1, %v58_v24 }
  0x17   :  { %688 = vmatprep.mubr.msk.bf16.mxu0 %vm77_vm1, %v59_v25  ;;  %717 = vmatpush3.bf16.msra.mxu0 %v777_v31 }
  0x18   :  { %768 = vmatpush3.bf16.msra.mxu1 %v777_v31  ;;  %718 = vmatprep.subr.bf16.mxu0 %v778_v55 }
  0x19   :  { %761 = vmatprep.subr.bf16.mxu1 %v778_v55 }
  0x1b   :  { %719 = vmatpush3.bf16.msra.mxu0 %v778_v55 }
  0x1c   :  { %769 = vmatpush3.bf16.msra.mxu1 %v778_v55  ;;  %720 = vmatprep.subr.bf16.mxu0 %v779_v56 }
  0x1d   :  { %762 = vmatprep.subr.bf16.mxu1 %v779_v56 }
  0x1e   :  { %689 = vmatmul.mubr.msk.bf16.gmra.mxu0 %vm77_vm1, %v60_v32 }
  0x1f   :  { %692 = vmatprep.mubr.msk.bf16.mxu0 %vm77_vm1, %v61_v33  ;;  %721 = vmatpush3.bf16.msra.mxu0 %v779_v56 }
  0x20   :  { %770 = vmatpush3.bf16.msra.mxu1 %v779_v56  ;;  %722 = vmatprep.subr.bf16.mxu0 %v780_v57 }
  0x21   :  { %763 = vmatprep.subr.bf16.mxu1 %v780_v57 }
  0x23   :  { %723 = vmatpush3.bf16.msra.mxu0 %v780_v57 }
  0x24   :  { %771 = vmatpush3.bf16.msra.mxu1 %v780_v57 }
  0x26   :  { %693 = vmatmul.mubr.msk.bf16.gmra.mxu0 %vm77_vm1, %v62_v38 }
  0x27   :  { %696 = vmatprep.mubr.msk.bf16.mxu0 %vm77_vm1, %v63_v39 }
  0x2e   :  { %697 = vmatmul.mubr.msk.bf16.gmra.mxu0 %vm77_vm1, %v64_v44 }
  0x2f   :  { %700 = vmatprep.mubr.msk.bf16.mxu0 %vm77_vm1, %v65_v45 }
  0x36   :  { %701 = vmatmul.mubr.msk.bf16.gmra.mxu0 %vm77_vm1, %v66_v50 }
  0x37   :  { %704 = vmatprep.mubr.msk.bf16.mxu0 %vm77_vm1, %v67_v51 }
  0x3e   :  { %705 = vmatmul.mubr.msk.bf16.gmra.mxu0 %vm77_vm1, %v68_v54 }
  0xc6   :  { %v678_v58 = vpop.f32.mrf.mxu0 }
  0xc7   :  { %v173_v0 = vadd.f32 %v678_v58, %v953_v60 }
  0xc8   :  { %v164_v59 = vpop.f32.mrf.mxu0 }
  0xc9   :  { %v165_v62 = vadd.f32 %v953_v60, %v164_v59  ;;  %v293_v7 = vmax.f32 %v173_v0, 0.0 }
  0xca   :  { %v679_v61 = vpop.f32.mrf.mxu0 }
  0xcb   :  { %v176_v63 = vadd.f32 %v679_v61, %v953_v60  ;;  %v291_v5 = vmax.f32 %v165_v62, 0.0 }
  0xcc   :  { %v167_v1 = vpop.f32.mrf.mxu0 }
  0xcd   :  { %v168_v2 = vadd.f32 %v953_v60, %v167_v1  ;;  %v294_v3 = vmax.f32 %v176_v63, 0.0 }
  0xce   :  { %v682_v4 = vpop.f32.mrf.mxu0 }
  0xcf   :  { %v292_v6 = vmax.f32 %v168_v2, 0.0  ;;  %v324_v10 = vpack.c.bf16 %v294_v3, %v293_v7  ;;  %v189_v14 = vadd.f32 %v682_v4, %v953_v60 }
  0xd0   :  { %v180_v8 = vpop.f32.mrf.mxu0 }
  0xd1   :  { %v323_v9 = vpack.c.bf16 %v292_v6, %v291_v5  ;;  %v181_v12 = vadd.f32 %v953_v60, %v180_v8  ;;  %v297_v21 = vmax.f32 %v189_v14, 0.0 }
  0xd2   :  { %v683_v11 = vpop.f32.mrf.mxu0 }
  0xd3   :  { %v192_v13 = vadd.f32 %v683_v11, %v953_v60  ;;  %724 = vmatprep.mubr.bf16.mxu0 %v323_v9  ;;  %v295_v19 = vmax.f32 %v181_v12, 0.0 }
  0xd4   :  { %v183_v15 = vpop.f32.mrf.mxu0  ;;  %725 = vmatmul.mubr.bf16.vlgmr.msra.gmra.mxu0 %v324_v10 }
  0xd5   :  { %v184_v16 = vadd.f32 %v953_v60, %v183_v15  ;;  %v298_v17 = vmax.f32 %v192_v13, 0.0 }
  0xd6   :  { %v686_v18 = vpop.f32.mrf.mxu0 }
  0xd7   :  { %v296_v20 = vmax.f32 %v184_v16, 0.0  ;;  %v326_v24 = vpack.c.bf16 %v298_v17, %v297_v21  ;;  %v205_v28 = vadd.f32 %v686_v18, %v953_v60 }
  0xd8   :  { %v196_v22 = vpop.f32.mrf.mxu0 }
  0xd9   :  { %v325_v23 = vpack.c.bf16 %v296_v20, %v295_v19  ;;  %v197_v26 = vadd.f32 %v953_v60, %v196_v22  ;;  %v301_v35 = vmax.f32 %v205_v28, 0.0 }
  0xda   :  { %v687_v25 = vpop.f32.mrf.mxu0 }
  0xdb   :  { %v208_v27 = vadd.f32 %v687_v25, %v953_v60  ;;  %728 = vmatprep.mubr.bf16.mxu1 %v325_v23  ;;  %v299_v33 = vmax.f32 %v197_v26, 0.0 }
  0xdc   :  { %v199_v29 = vpop.f32.mrf.mxu0  ;;  %729 = vmatmul.mubr.bf16.vlgmr.msra.gmra.mxu1 %v326_v24 }
  0xdd   :  { %v200_v30 = vadd.f32 %v953_v60, %v199_v29  ;;  %v302_v31 = vmax.f32 %v208_v27, 0.0 }
  0xde   :  { %v690_v32 = vpop.f32.mrf.mxu0 }
  0xdf   :  { %v300_v34 = vmax.f32 %v200_v30, 0.0  ;;  %v328_v38 = vpack.c.bf16 %v302_v31, %v301_v35  ;;  %v221_v42 = vadd.f32 %v690_v32, %v953_v60 }
  0xe0   :  { %v212_v36 = vpop.f32.mrf.mxu0 }
  0xe1   :  { %v327_v37 = vpack.c.bf16 %v300_v34, %v299_v33  ;;  %v213_v40 = vadd.f32 %v953_v60, %v212_v36  ;;  %v305_v49 = vmax.f32 %v221_v42, 0.0 }
  0xe2   :  { %v691_v39 = vpop.f32.mrf.mxu0 }
  0xe3   :  { %v224_v41 = vadd.f32 %v691_v39, %v953_v60  ;;  %732 = vmatprep.mubr.bf16.mxu1 %v327_v37  ;;  %v303_v47 = vmax.f32 %v213_v40, 0.0 }
  0xe4   :  { %v215_v43 = vpop.f32.mrf.mxu0  ;;  %733 = vmatmul.mubr.bf16.gmra.mxu1 %v328_v38 }
  0xe5   :  { %v216_v44 = vadd.f32 %v953_v60, %v215_v43  ;;  %v306_v45 = vmax.f32 %v224_v41, 0.0 }
  0xe6   :  { %v694_v46 = vpop.f32.mrf.mxu0 }
  0xe7   :  { %v304_v48 = vmax.f32 %v216_v44, 0.0  ;;  %v330_v52 = vpack.c.bf16 %v306_v45, %v305_v49  ;;  %v237_v56 = vadd.f32 %v694_v46, %v953_v60  ;;  %v990_v44 = vld [vmem:[%s1124_s4] ss:$0 sm:$0xff] }
  0xe8   :  { %v228_v50 = vpop.f32.mrf.mxu0 }
  0xe9   :  { %v329_v51 = vpack.c.bf16 %v304_v48, %v303_v47  ;;  %v229_v54 = vadd.f32 %v953_v60, %v228_v50  ;;  %v309_v0 = vmax.f32 %v237_v56, 0.0 }
  0xea   :  { %v695_v53 = vpop.f32.mrf.mxu0 }
  0xeb   :  { %v240_v55 = vadd.f32 %v695_v53, %v953_v60  ;;  %736 = vmatprep.mubr.bf16.mxu1 %v329_v51  ;;  %v307_v62 = vmax.f32 %v229_v54, 0.0 }
  0xec   :  { %v231_v57 = vpop.f32.mrf.mxu0  ;;  %737 = vmatmul.mubr.bf16.gmra.mxu1 %v330_v52 }
  0xed   :  { %v232_v58 = vadd.f32 %v953_v60, %v231_v57  ;;  %v310_v59 = vmax.f32 %v240_v55, 0.0 }
  0xee   :  { %v698_v61 = vpop.f32.mrf.mxu0 }
  0xef   :  { %v308_v63 = vmax.f32 %v232_v58, 0.0  ;;  %v332_v3 = vpack.c.bf16 %v310_v59, %v309_v0  ;;  %v253_v7 = vadd.f32 %v698_v61, %v953_v60 }
  0xf0   :  { %v244_v1 = vpop.f32.mrf.mxu0 }
  0xf1   :  { %v331_v2 = vpack.c.bf16 %v308_v63, %v307_v62  ;;  %v245_v5 = vadd.f32 %v953_v60, %v244_v1  ;;  %v313_v14 = vmax.f32 %v253_v7, 0.0 }
  0xf2   :  { %v699_v4 = vpop.f32.mrf.mxu0 }
  0xf3   :  { %v256_v6 = vadd.f32 %v699_v4, %v953_v60  ;;  %740 = vmatprep.mubr.bf16.mxu1 %v331_v2  ;;  %v311_v12 = vmax.f32 %v245_v5, 0.0 }
  0xf4   :  { %v247_v8 = vpop.f32.mrf.mxu0  ;;  %741 = vmatmul.mubr.bf16.gmra.mxu1 %v332_v3 }
  0xf5   :  { %v248_v9 = vadd.f32 %v953_v60, %v247_v8  ;;  %v314_v10 = vmax.f32 %v256_v6, 0.0 }
  0xf6   :  { %v702_v11 = vpop.f32.mrf.mxu0 }
  0xf7   :  { %v312_v13 = vmax.f32 %v248_v9, 0.0  ;;  %v334_v17 = vpack.c.bf16 %v314_v10, %v313_v14  ;;  %v269_v21 = vadd.f32 %v702_v11, %v953_v60 }
  0xf8   :  { %v260_v15 = vpop.f32.mrf.mxu0 }
  0xf9   :  { %v333_v16 = vpack.c.bf16 %v312_v13, %v311_v12  ;;  %v261_v19 = vadd.f32 %v953_v60, %v260_v15  ;;  %v317_v28 = vmax.f32 %v269_v21, 0.0 }
  0xfa   :  { %v703_v18 = vpop.f32.mrf.mxu0 }
  0xfb   :  { %v272_v20 = vadd.f32 %v703_v18, %v953_v60  ;;  %744 = vmatprep.mubr.bf16.mxu1 %v333_v16  ;;  %v315_v26 = vmax.f32 %v261_v19, 0.0 }
  0xfc   :  { %v263_v22 = vpop.f32.mrf.mxu0  ;;  %745 = vmatmul.mubr.bf16.gmra.mxu1 %v334_v17 }
  0xfd   :  { %v264_v23 = vadd.f32 %v953_v60, %v263_v22  ;;  %v318_v24 = vmax.f32 %v272_v20, 0.0 }
  0xfe   :  { %v706_v25 = vpop.f32.mrf.mxu0 }
  0xff   :  { %v316_v27 = vmax.f32 %v264_v23, 0.0  ;;  %v336_v31 = vpack.c.bf16 %v318_v24, %v317_v28  ;;  %v285_v35 = vadd.f32 %v706_v25, %v953_v60 }
 0x100   :  { %v276_v29 = vpop.f32.mrf.mxu0 }
 0x101   :  { %v335_v30 = vpack.c.bf16 %v316_v27, %v315_v26  ;;  %v277_v33 = vadd.f32 %v953_v60, %v276_v29  ;;  %v321_v41 = vmax.f32 %v285_v35, 0.0 }
 0x102   :  { %v707_v32 = vpop.f32.mrf.mxu0 }
 0x103   :  { %v288_v34 = vadd.f32 %v707_v32, %v953_v60  ;;  %748 = vmatprep.mubr.bf16.mxu1 %v335_v30  ;;  %v319_v39 = vmax.f32 %v277_v33, 0.0 }
 0x104   :  { %v279_v36 = vpop.f32.mrf.mxu0  ;;  %749 = vmatmul.mubr.bf16.gmra.mxu1 %v336_v31 }
 0x105   :  { %v280_v37 = vadd.f32 %v953_v60, %v279_v36  ;;  %v322_v38 = vmax.f32 %v288_v34, 0.0 }
 0x107   :  { %v320_v40 = vmax.f32 %v280_v37, 0.0  ;;  %v338_v43 = vpack.c.bf16 %v322_v38, %v321_v41 }
 0x109   :  { %v337_v42 = vpack.c.bf16 %v320_v40, %v319_v39 }
 0x10b   :  { %752 = vmatprep.mubr.bf16.mxu1 %v337_v42 }
 0x10c   :  { %753 = vmatmul.mubr.bf16.gmra.mxu1 %v338_v43 }
 0x194   :  { %v726_v45 = vpop.f32.mrf.mxu0 }
 0x195   :  { %v453_v46 = vadd.f32 %v726_v45, %v990_v44 }
 0x196   :  { %v444_v47 = vpop.f32.mrf.mxu0 }
 0x197   :  { %573 = vst [vmem:[%s1125_s5 + $0x10] sm:$0xff] %v453_v46  ;;  %v445_v60 = vadd.f32 %v990_v44, %v444_v47 }
 0x198   :  { %v727_v48 = vpop.f32.mrf.mxu0 }
 0x199   :  { %571 = vst [vmem:[%s1125_s5] sm:$0xff] %v445_v60  ;;  %v456_v49 = vadd.f32 %v727_v48, %v990_v44 }
 0x19a   :  { %v447_v50 = vpop.f32.mrf.mxu0 }
 0x19b   :  { %574 = vst [vmem:[%s1125_s5 + $0x18] sm:$0xff] %v456_v49  ;;  %v448_v51 = vadd.f32 %v990_v44, %v447_v50 }
 0x19c   :  { %v730_v52 = vpop.f32.mrf.mxu1 }
 0x19d   :  { %572 = vst [vmem:[%s1125_s5 + $0x8] sm:$0xff] %v448_v51  ;;  %v469_v53 = vadd.f32 %v730_v52, %v990_v44 }
 0x19e   :  { %v460_v54 = vpop.f32.mrf.mxu1 }
 0x19f   :  { %577 = vst [vmem:[%s1125_s5 + $0x30] sm:$0xff] %v469_v53  ;;  %v461_v55 = vadd.f32 %v990_v44, %v460_v54 }
 0x1a0   :  { %v731_v56 = vpop.f32.mrf.mxu1 }
 0x1a1   :  { %575 = vst [vmem:[%s1125_s5 + $0x20] sm:$0xff] %v461_v55  ;;  %v472_v57 = vadd.f32 %v731_v56, %v990_v44 }
 0x1a2   :  { %v463_v58 = vpop.f32.mrf.mxu1 }
 0x1a3   :  { %578 = vst [vmem:[%s1125_s5 + $0x38] sm:$0xff] %v472_v57  ;;  %v464_v59 = vadd.f32 %v990_v44, %v463_v58 }
 0x1a4   :  { %v734_v61 = vpop.f32.mrf.mxu1 }
 0x1a5   :  { %576 = vst [vmem:[%s1125_s5 + $0x28] sm:$0xff] %v464_v59  ;;  %v485_v62 = vadd.f32 %v734_v61, %v990_v44 }
 0x1a6   :  { %v476_v63 = vpop.f32.mrf.mxu1 }
 0x1a7   :  { %581 = vst [vmem:[%s1125_s5 + $0x50] sm:$0xff] %v485_v62  ;;  %v477_v0 = vadd.f32 %v990_v44, %v476_v63 }
 0x1a8   :  { %v735_v1 = vpop.f32.mrf.mxu1 }
 0x1a9   :  { %579 = vst [vmem:[%s1125_s5 + $0x40] sm:$0xff] %v477_v0  ;;  %v488_v2 = vadd.f32 %v735_v1, %v990_v44 }
 0x1aa   :  { %v479_v3 = vpop.f32.mrf.mxu1 }
 0x1ab   :  { %582 = vst [vmem:[%s1125_s5 + $0x58] sm:$0xff] %v488_v2  ;;  %v480_v4 = vadd.f32 %v990_v44, %v479_v3 }
 0x1ac   :  { %v738_v5 = vpop.f32.mrf.mxu1 }
 0x1ad   :  { %580 = vst [vmem:[%s1125_s5 + $0x48] sm:$0xff] %v480_v4  ;;  %v501_v6 = vadd.f32 %v738_v5, %v990_v44 }
 0x1ae   :  { %v492_v7 = vpop.f32.mrf.mxu1 }
 0x1af   :  { %585 = vst [vmem:[%s1125_s5 + $0x70] sm:$0xff] %v501_v6  ;;  %v493_v8 = vadd.f32 %v990_v44, %v492_v7 }
 0x1b0   :  { %v739_v9 = vpop.f32.mrf.mxu1 }
 0x1b1   :  { %583 = vst [vmem:[%s1125_s5 + $0x60] sm:$0xff] %v493_v8  ;;  %v504_v10 = vadd.f32 %v739_v9, %v990_v44 }
 0x1b2   :  { %v495_v11 = vpop.f32.mrf.mxu1 }
 0x1b3   :  { %586 = vst [vmem:[%s1125_s5 + $0x78] sm:$0xff] %v504_v10  ;;  %v496_v12 = vadd.f32 %v990_v44, %v495_v11 }
 0x1b4   :  { %v742_v13 = vpop.f32.mrf.mxu1 }
 0x1b5   :  { %584 = vst [vmem:[%s1125_s5 + $0x68] sm:$0xff] %v496_v12  ;;  %v517_v14 = vadd.f32 %v742_v13, %v990_v44 }
 0x1b6   :  { %v508_v15 = vpop.f32.mrf.mxu1 }
 0x1b7   :  { %589 = vst [vmem:[%s1125_s5 + $0x90] sm:$0xff] %v517_v14  ;;  %v509_v16 = vadd.f32 %v990_v44, %v508_v15 }
 0x1b8   :  { %v743_v17 = vpop.f32.mrf.mxu1 }
 0x1b9   :  { %587 = vst [vmem:[%s1125_s5 + $0x80] sm:$0xff] %v509_v16  ;;  %v520_v18 = vadd.f32 %v743_v17, %v990_v44 }
 0x1ba   :  { %v511_v19 = vpop.f32.mrf.mxu1 }
 0x1bb   :  { %590 = vst [vmem:[%s1125_s5 + $0x98] sm:$0xff] %v520_v18  ;;  %v512_v20 = vadd.f32 %v990_v44, %v511_v19 }
 0x1bc   :  { %v746_v21 = vpop.f32.mrf.mxu1 }
 0x1bd   :  { %588 = vst [vmem:[%s1125_s5 + $0x88] sm:$0xff] %v512_v20  ;;  %v533_v22 = vadd.f32 %v746_v21, %v990_v44 }
 0x1be   :  { %v524_v23 = vpop.f32.mrf.mxu1 }
 0x1bf   :  { %593 = vst [vmem:[%s1125_s5 + $0xb0] sm:$0xff] %v533_v22  ;;  %v525_v24 = vadd.f32 %v990_v44, %v524_v23 }
 0x1c0   :  { %v747_v25 = vpop.f32.mrf.mxu1 }
 0x1c1   :  { %591 = vst [vmem:[%s1125_s5 + $0xa0] sm:$0xff] %v525_v24  ;;  %v536_v26 = vadd.f32 %v747_v25, %v990_v44 }
 0x1c2   :  { %v527_v27 = vpop.f32.mrf.mxu1 }
 0x1c3   :  { %594 = vst [vmem:[%s1125_s5 + $0xb8] sm:$0xff] %v536_v26  ;;  %v528_v28 = vadd.f32 %v990_v44, %v527_v27 }
 0x1c4   :  { %v750_v29 = vpop.f32.mrf.mxu1 }
 0x1c5   :  { %592 = vst [vmem:[%s1125_s5 + $0xa8] sm:$0xff] %v528_v28  ;;  %v549_v30 = vadd.f32 %v750_v29, %v990_v44 }
 0x1c6   :  { %v540_v31 = vpop.f32.mrf.mxu1 }
 0x1c7   :  { %597 = vst [vmem:[%s1125_s5 + $0xd0] sm:$0xff] %v549_v30  ;;  %v541_v32 = vadd.f32 %v990_v44, %v540_v31 }
 0x1c8   :  { %v751_v33 = vpop.f32.mrf.mxu1 }
 0x1c9   :  { %595 = vst [vmem:[%s1125_s5 + $0xc0] sm:$0xff] %v541_v32  ;;  %v552_v34 = vadd.f32 %v751_v33, %v990_v44 }
 0x1ca   :  { %v543_v35 = vpop.f32.mrf.mxu1 }
 0x1cb   :  { %598 = vst [vmem:[%s1125_s5 + $0xd8] sm:$0xff] %v552_v34  ;;  %v544_v36 = vadd.f32 %v990_v44, %v543_v35 }
 0x1cc   :  { %v754_v37 = vpop.f32.mrf.mxu1 }
 0x1cd   :  { %596 = vst [vmem:[%s1125_s5 + $0xc8] sm:$0xff] %v544_v36  ;;  %v565_v38 = vadd.f32 %v754_v37, %v990_v44 }
 0x1ce   :  { %v556_v39 = vpop.f32.mrf.mxu1 }
 0x1cf   :  { %601 = vst [vmem:[%s1125_s5 + $0xf0] sm:$0xff] %v565_v38  ;;  %v557_v40 = vadd.f32 %v990_v44, %v556_v39 }
 0x1d0   :  { %v755_v41 = vpop.f32.mrf.mxu1 }
 0x1d1   :  { %599 = vst [vmem:[%s1125_s5 + $0xe0] sm:$0xff] %v557_v40  ;;  %v568_v42 = vadd.f32 %v755_v41, %v990_v44 }
 0x1d2   :  { %v559_v43 = vpop.f32.mrf.mxu1 }
 0x1d3   :  { %602 = vst [vmem:[%s1125_s5 + $0xf8] sm:$0xff] %v568_v42  ;;  %v560_v45 = vadd.f32 %v990_v44, %v559_v43 }
 0x1d5   :  { %600 = vst [vmem:[%s1125_s5 + $0xe8] sm:$0xff] %v560_v45 }

</bundles_post_ra>
